<compile_context>
chip_gen: v7x
topology: tpu7x:2x2x1
jax: 0.10.0
libtpu: 0.0.40
codegen_flags: <defaults>
</compile_context>

<pallas_src>
import functools

import jax
import jax.numpy as jnp
import numpy as np
from jax import lax
from jax.experimental import pallas as pl
from jax.experimental.pallas import tpu as pltpu

_THR = 1.0


def _mxu_dot(a, b):
    # bf16 operands into the MXU, f32 accumulation (spikes are exact in bf16).
    return jnp.dot(a.astype(jnp.bfloat16), b.astype(jnp.bfloat16),
                   preferred_element_type=jnp.float32)


def _lif_scan_inplace(ref, beta, num_steps, batch, unroll):
    """In-place Leaky scan on a (T*B, W) f32 ref.

    On entry `ref` holds the per-step input currents; on exit it holds the
    per-step membrane traces. Pure VPU work: ~1 mul, 2 add/sub, 1 compare per
    step plus one sublane-aligned load and one store.
    """
    width = ref.shape[1]

    def step(t, carry):
        mem, spk = carry
        row = pl.multiple_of(t * batch, batch)
        cur = ref[pl.ds(row, batch), :]
        mem = beta * mem + cur - spk * _THR          # reset = previous spike
        ref[pl.ds(row, batch), :] = mem
        spk = (mem > _THR).astype(jnp.float32)
        return mem, spk

    init = (jnp.zeros((batch, width), jnp.float32),
            jnp.zeros((batch, width), jnp.float32))
    lax.fori_loop(0, num_steps, step, init, unroll=unroll)


def petnet_kernel(*refs, num_layers, num_steps, batch, unroll):
    """Whole problem resident in VMEM; time loops are pure-VPU scans.

    refs = (x2d, w1, b1, [w2, b2,] wo, bo, betas, spk_out, mem_out, work)
    x2d is time-major, flattened to (T*B, Nin) in bf16. Outputs are (T*B, Opad).
    """
    if num_layers == 2:
        (x_ref, w1_ref, b1_ref, w2_ref, b2_ref, wo_ref, bo_ref, beta_ref,
         spk_ref, mem_ref, work_ref) = refs
    else:
        (x_ref, w1_ref, b1_ref, wo_ref, bo_ref, beta_ref,
         spk_ref, mem_ref, work_ref) = refs
        w2_ref = b2_ref = None

    B = batch
    beta1 = beta_ref[0]
    beta2 = beta_ref[1]
    betao = beta_ref[2]

    # ---- layer 1: one big MXU matmul covering all T steps ----
    work_ref[...] = jnp.dot(x_ref[...], w1_ref[...],
                            preferred_element_type=jnp.float32) + b1_ref[...]
    _lif_scan_inplace(work_ref, beta1, num_steps, B, unroll)
    spk_all = (work_ref[...] > _THR).astype(jnp.bfloat16)   # whole spike train

    # ---- optional hidden layer 2: one MXU matmul + one scan ----
    if num_layers == 2:
        work_ref[...] = jnp.dot(spk_all, w2_ref[...],
                                preferred_element_type=jnp.float32) + b2_ref[...]
        _lif_scan_inplace(work_ref, beta2, num_steps, B, unroll)
        spk_all = (work_ref[...] > _THR).astype(jnp.bfloat16)

    # ---- output layer: stage curo in the mem output buffer, scan in place ----
    mem_ref[...] = jnp.dot(spk_all, wo_ref[...],
                           preferred_element_type=jnp.float32) + bo_ref[...]
    _lif_scan_inplace(mem_ref, betao, num_steps, B, unroll)

    # One lane-dense full-block store for the whole spike record (bf16, 0/1).
    spk_ref[...] = (mem_ref[...] > _THR).astype(spk_ref.dtype)


def petnet_forward(x, w1, b1, w2, b2, wo, bo, betas, *, num_layers=1, unroll=8):
    T, B, Nin = x.shape
    H = w1.shape[1]
    O = wo.shape[1]
    Opad = pl.cdiv(O, 128) * 128                     # lane-dense output stores

    # bf16 casts in the wrapper: halves HBM->VMEM bytes; matmuls cast anyway.
    x2d = x.reshape(T * B, Nin).astype(jnp.bfloat16)
    w1_b = w1.astype(jnp.bfloat16)
    wo_p = jnp.pad(wo, ((0, 0), (0, Opad - O))).astype(jnp.bfloat16)
    bo_p = jnp.pad(bo, ((0, 0), (0, Opad - O)))
    betas_c = jnp.clip(betas.astype(jnp.float32), 0.0, 1.0)   # snntorch clamps beta

    vmem = pl.BlockSpec(memory_space=pltpu.MemorySpace.VMEM)
    smem = pl.BlockSpec(memory_space=pltpu.MemorySpace.SMEM)

    if num_layers == 2:
        inputs = (x2d, w1_b, b1, w2.astype(jnp.bfloat16), b2, wo_p, bo_p, betas_c)
    else:
        # Do not DMA / keep resident the unused hidden-2 weights.
        inputs = (x2d, w1_b, b1, wo_p, bo_p, betas_c)
    in_specs = [vmem] * (len(inputs) - 1) + [smem]

    # Explicit VMEM budget for the whole-resident design.
    footprint = sum(int(np.prod(a.shape)) * a.dtype.itemsize for a in inputs)
    footprint += T * B * Opad * (2 + 4)              # spk (bf16) + mem (f32) outputs
    footprint += T * B * H * 4                       # work scratch
    vmem_limit = int(min(64 << 20, max(16 << 20, 2 * footprint)))

    spk2d, mem2d = pl.pallas_call(
        functools.partial(petnet_kernel, num_layers=num_layers,
                          num_steps=T, batch=B, unroll=min(T, unroll)),
        out_shape=(jax.ShapeDtypeStruct((T * B, Opad), jnp.bfloat16),
                   jax.ShapeDtypeStruct((T * B, Opad), jnp.float32)),
        in_specs=in_specs,
        out_specs=(vmem, vmem),
        scratch_shapes=[pltpu.VMEM((T * B, H), jnp.float32)],   # cur/mem work buffer
        compiler_params=pltpu.CompilerParams(vmem_limit_bytes=vmem_limit),
    )(*inputs)

    spk = spk2d[:, :O].astype(jnp.float32).reshape(T, B, O)
    mem = mem2d[:, :O].reshape(T, B, O)
    return spk, mem


def petnet_reference(x, w1, b1, w2, b2, wo, bo, betas, *, num_layers=1):
    """Pure-JAX reference mirroring the PyTorch forward (same MXU precision)."""
    T, B, _ = x.shape
    H, O = w1.shape[1], wo.shape[1]
    beta1, beta2, betao = (jnp.clip(betas[i].astype(jnp.float32), 0.0, 1.0)
                           for i in range(3))
    mem1 = jnp.zeros((B, H), jnp.float32)
    mem2 = jnp.zeros((B, H), jnp.float32)
    memo = jnp.zeros((B, O), jnp.float32)
    spks, mems = [], []
    for t in range(T):
        cur1 = _mxu_dot(x[t], w1) + b1
        mem1 = beta1 * mem1 + cur1 - jnp.where(mem1 > _THR, _THR, 0.0)
        pre = (mem1 > _THR).astype(jnp.float32)
        if num_layers == 2:
            cur2 = _mxu_dot(pre, w2) + b2
            mem2 = beta2 * mem2 + cur2 - jnp.where(mem2 > _THR, _THR, 0.0)
            pre = (mem2 > _THR).astype(jnp.float32)
        curo = _mxu_dot(pre, wo) + bo
        memo = betao * memo + curo - jnp.where(memo > _THR, _THR, 0.0)
        spks.append((memo > _THR).astype(jnp.float32))
        mems.append(memo)
    return jnp.stack(spks), jnp.stack(mems)


def init_params(key, num_inputs, num_hidden, num_outputs, beta=0.95):
    """Deterministic init matching nn.Linear's U(-1/sqrt(fan_in), +1/sqrt(fan_in))."""
    ks = jax.random.split(key, 6)

    def lin(kw, kb, fan_in, fan_out):
        k = 1.0 / np.sqrt(fan_in)
        w = jax.random.uniform(kw, (fan_in, fan_out), jnp.float32, -k, k)
        b = jax.random.uniform(kb, (1, fan_out), jnp.float32, -k, k)
        return w, b

    w1, b1 = lin(ks[0], ks[1], num_inputs, num_hidden)
    w2, b2 = lin(ks[2], ks[3], num_hidden, num_hidden)
    wo, bo = lin(ks[4], ks[5], num_hidden, num_outputs)
    betas = jnp.full((3,), beta, jnp.float32)   # learn_beta=True scalars
    return w1, b1, w2, b2, wo, bo, betas


if __name__ == "__main__":
    # x: [num_steps, batch, num_inputs] (time-major), small shapes.
    num_steps, batch = 8, 8
    num_inputs, num_hidden, num_outputs = 64, 32, 10

    key = jax.random.PRNGKey(0)
    kx, kp = jax.random.split(key)
    x = jax.random.normal(kx, (num_steps, batch, num_inputs), jnp.float32)
    params = init_params(kp, num_inputs, num_hidden, num_outputs, beta=0.95)

    ok = True
    for num_layers in (1, 2):
        spk, mem = petnet_forward(x, *params, num_layers=num_layers)
        jax.block_until_ready((spk, mem))
        ref_spk, ref_mem = petnet_reference(x, *params, num_layers=num_layers)

        spk_np, mem_np = np.asarray(spk), np.asarray(mem)
        rspk_np, rmem_np = np.asarray(ref_spk), np.asarray(ref_mem)
        spk_mismatch = float(np.mean(spk_np != rspk_np))
        mem_err = float(np.max(np.abs(mem_np - rmem_np)))
        if spk_mismatch > 0.01 or mem_err > 0.1:
            ok = False
            print(f"layers={num_layers}: spk_mismatch={spk_mismatch:.4f} "
                  f"mem_err={mem_err:.2e}")

    if ok:
        print("KERNEL_OK")
</pallas_src>

<mosaic_0001>
module attributes {stable_mosaic.version = 11 : i64} {
  func.func @petnet_kernel(%arg0: memref<64x64xbf16, #tpu.memory_space<vmem>>, %arg1: memref<64x32xbf16, #tpu.memory_space<vmem>>, %arg2: memref<1x32xf32, #tpu.memory_space<vmem>>, %arg3: memref<32x128xbf16, #tpu.memory_space<vmem>>, %arg4: memref<1x128xf32, #tpu.memory_space<vmem>>, %arg5: memref<3xf32, #tpu.memory_space<smem>>, %arg6: memref<64x128xbf16, #tpu.memory_space<vmem>>, %arg7: memref<64x128xf32, #tpu.memory_space<vmem>>, %arg8: memref<64x32xf32, #tpu.memory_space<vmem>>) attributes {dimension_semantics = [], scalar_prefetch = 0 : i64, scratch_operands = 1 : i64, tpu.core_type = #tpu.core_type<tc>} {
    %c0 = arith.constant 0 : index
    %0 = memref.load %arg5[%c0] : memref<3xf32, #tpu.memory_space<smem>>
    %c2 = arith.constant 2 : index
    %1 = memref.load %arg5[%c2] : memref<3xf32, #tpu.memory_space<smem>>
    %c0_0 = arith.constant 0 : index
    %c0_1 = arith.constant 0 : index
    %2 = vector.load %arg0[%c0_0, %c0_1] : memref<64x64xbf16, #tpu.memory_space<vmem>>, vector<64x64xbf16>
    %c0_2 = arith.constant 0 : index
    %c0_3 = arith.constant 0 : index
    %3 = vector.load %arg1[%c0_2, %c0_3] : memref<64x32xbf16, #tpu.memory_space<vmem>>, vector<64x32xbf16>
    %cst = arith.constant dense<0.000000e+00> : vector<64x32xf32>
    %4 = tpu.matmul %2, %3, %cst {dimension_numbers = #tpu.dot_dimension_numbers<[1], [0], [0], [1], [0, 0, 1, 1], [], []>} : vector<64x64xbf16>, vector<64x32xbf16>, vector<64x32xf32> -> vector<64x32xf32>
    %c0_4 = arith.constant 0 : index
    %c0_5 = arith.constant 0 : index
    %5 = vector.load %arg2[%c0_4, %c0_5] : memref<1x32xf32, #tpu.memory_space<vmem>>, vector<1x32xf32>
    %6 = vector.broadcast %5 : vector<1x32xf32> to vector<64x32xf32>
    %7 = arith.addf %4, %6 : vector<64x32xf32>
    %c0_6 = arith.constant 0 : index
    %c0_7 = arith.constant 0 : index
    %8 = vector.load %arg8[%c0_6, %c0_7] : memref<64x32xf32, #tpu.memory_space<vmem>>, vector<64x32xf32>
    tpu.vector_store %arg8[%c0_6, %c0_7], %7 {strides = array<i32>} : memref<64x32xf32, #tpu.memory_space<vmem>>, vector<64x32xf32>,
    %cst_8 = arith.constant 0.000000e+00 : f32
    %9 = vector.broadcast %cst_8 : f32 to vector<8x32xf32>
    %cst_9 = arith.constant 0.000000e+00 : f32
    %10 = vector.broadcast %cst_9 : f32 to vector<8x32xf32>
    %c0_i32 = arith.constant 0 : i32
    %c8_i32 = arith.constant 8 : i32
    %11 = arith.muli %c0_i32, %c8_i32 : i32
    %12 = tpu.assume_multiple %11, 8 : i32
    %13 = arith.index_cast %12 : i32 to index
    %c0_10 = arith.constant 0 : index
    %14 = vector.load %arg8[%13, %c0_10] : memref<64x32xf32, #tpu.memory_space<vmem>>, vector<8x32xf32>
    %15 = vector.broadcast %0 : f32 to vector<8x32xf32>
    %16 = arith.mulf %15, %9 : vector<8x32xf32>
    %17 = arith.addf %16, %14 : vector<8x32xf32>
    %cst_11 = arith.constant 1.000000e+00 : f32
    %18 = vector.broadcast %cst_11 : f32 to vector<8x32xf32>
    %19 = arith.mulf %10, %18 : vector<8x32xf32>
    %20 = arith.subf %17, %19 : vector<8x32xf32>
    %21 = arith.index_cast %12 : i32 to index
    %c0_12 = arith.constant 0 : index
    %22 = vector.load %arg8[%21, %c0_12] : memref<64x32xf32, #tpu.memory_space<vmem>>, vector<8x32xf32>
    tpu.vector_store %arg8[%21, %c0_12], %20 {strides = array<i32>} : memref<64x32xf32, #tpu.memory_space<vmem>>, vector<8x32xf32>,
    %cst_13 = arith.constant 1.000000e+00 : f32
    %23 = vector.broadcast %cst_13 : f32 to vector<8x32xf32>
    %24 = arith.cmpf ogt, %20, %23 : vector<8x32xf32>
    %25 = arith.extui %24 : vector<8x32xi1> to vector<8x32xi32>
    %26 = arith.sitofp %25 : vector<8x32xi32> to vector<8x32xf32>
    %c1_i32 = arith.constant 1 : i32
    %c8_i32_14 = arith.constant 8 : i32
    %27 = arith.muli %c1_i32, %c8_i32_14 : i32
    %28 = tpu.assume_multiple %27, 8 : i32
    %29 = arith.index_cast %28 : i32 to index
    %c0_15 = arith.constant 0 : index
    %30 = vector.load %arg8[%29, %c0_15] : memref<64x32xf32, #tpu.memory_space<vmem>>, vector<8x32xf32>
    %31 = vector.broadcast %0 : f32 to vector<8x32xf32>
    %32 = arith.mulf %31, %20 : vector<8x32xf32>
    %33 = arith.addf %32, %30 : vector<8x32xf32>
    %cst_16 = arith.constant 1.000000e+00 : f32
    %34 = vector.broadcast %cst_16 : f32 to vector<8x32xf32>
    %35 = arith.mulf %26, %34 : vector<8x32xf32>
    %36 = arith.subf %33, %35 : vector<8x32xf32>
    %37 = arith.index_cast %28 : i32 to index
    %c0_17 = arith.constant 0 : index
    %38 = vector.load %arg8[%37, %c0_17] : memref<64x32xf32, #tpu.memory_space<vmem>>, vector<8x32xf32>
    tpu.vector_store %arg8[%37, %c0_17], %36 {strides = array<i32>} : memref<64x32xf32, #tpu.memory_space<vmem>>, vector<8x32xf32>,
    %cst_18 = arith.constant 1.000000e+00 : f32
    %39 = vector.broadcast %cst_18 : f32 to vector<8x32xf32>
    %40 = arith.cmpf ogt, %36, %39 : vector<8x32xf32>
    %41 = arith.extui %40 : vector<8x32xi1> to vector<8x32xi32>
    %42 = arith.sitofp %41 : vector<8x32xi32> to vector<8x32xf32>
    %c2_i32 = arith.constant 2 : i32
    %c8_i32_19 = arith.constant 8 : i32
    %43 = arith.muli %c2_i32, %c8_i32_19 : i32
    %44 = tpu.assume_multiple %43, 8 : i32
    %45 = arith.index_cast %44 : i32 to index
    %c0_20 = arith.constant 0 : index
    %46 = vector.load %arg8[%45, %c0_20] : memref<64x32xf32, #tpu.memory_space<vmem>>, vector<8x32xf32>
    %47 = vector.broadcast %0 : f32 to vector<8x32xf32>
    %48 = arith.mulf %47, %36 : vector<8x32xf32>
    %49 = arith.addf %48, %46 : vector<8x32xf32>
    %cst_21 = arith.constant 1.000000e+00 : f32
    %50 = vector.broadcast %cst_21 : f32 to vector<8x32xf32>
    %51 = arith.mulf %42, %50 : vector<8x32xf32>
    %52 = arith.subf %49, %51 : vector<8x32xf32>
    %53 = arith.index_cast %44 : i32 to index
    %c0_22 = arith.constant 0 : index
    %54 = vector.load %arg8[%53, %c0_22] : memref<64x32xf32, #tpu.memory_space<vmem>>, vector<8x32xf32>
    tpu.vector_store %arg8[%53, %c0_22], %52 {strides = array<i32>} : memref<64x32xf32, #tpu.memory_space<vmem>>, vector<8x32xf32>,
    %cst_23 = arith.constant 1.000000e+00 : f32
    %55 = vector.broadcast %cst_23 : f32 to vector<8x32xf32>
    %56 = arith.cmpf ogt, %52, %55 : vector<8x32xf32>
    %57 = arith.extui %56 : vector<8x32xi1> to vector<8x32xi32>
    %58 = arith.sitofp %57 : vector<8x32xi32> to vector<8x32xf32>
    %c3_i32 = arith.constant 3 : i32
    %c8_i32_24 = arith.constant 8 : i32
    %59 = arith.muli %c3_i32, %c8_i32_24 : i32
    %60 = tpu.assume_multiple %59, 8 : i32
    %61 = arith.index_cast %60 : i32 to index
    %c0_25 = arith.constant 0 : index
    %62 = vector.load %arg8[%61, %c0_25] : memref<64x32xf32, #tpu.memory_space<vmem>>, vector<8x32xf32>
    %63 = vector.broadcast %0 : f32 to vector<8x32xf32>
    %64 = arith.mulf %63, %52 : vector<8x32xf32>
    %65 = arith.addf %64, %62 : vector<8x32xf32>
    %cst_26 = arith.constant 1.000000e+00 : f32
    %66 = vector.broadcast %cst_26 : f32 to vector<8x32xf32>
    %67 = arith.mulf %58, %66 : vector<8x32xf32>
    %68 = arith.subf %65, %67 : vector<8x32xf32>
    %69 = arith.index_cast %60 : i32 to index
    %c0_27 = arith.constant 0 : index
    %70 = vector.load %arg8[%69, %c0_27] : memref<64x32xf32, #tpu.memory_space<vmem>>, vector<8x32xf32>
    tpu.vector_store %arg8[%69, %c0_27], %68 {strides = array<i32>} : memref<64x32xf32, #tpu.memory_space<vmem>>, vector<8x32xf32>,
    %cst_28 = arith.constant 1.000000e+00 : f32
    %71 = vector.broadcast %cst_28 : f32 to vector<8x32xf32>
    %72 = arith.cmpf ogt, %68, %71 : vector<8x32xf32>
    %73 = arith.extui %72 : vector<8x32xi1> to vector<8x32xi32>
    %74 = arith.sitofp %73 : vector<8x32xi32> to vector<8x32xf32>
    %c4_i32 = arith.constant 4 : i32
    %c8_i32_29 = arith.constant 8 : i32
    %75 = arith.muli %c4_i32, %c8_i32_29 : i32
    %76 = tpu.assume_multiple %75, 8 : i32
    %77 = arith.index_cast %76 : i32 to index
    %c0_30 = arith.constant 0 : index
    %78 = vector.load %arg8[%77, %c0_30] : memref<64x32xf32, #tpu.memory_space<vmem>>, vector<8x32xf32>
    %79 = vector.broadcast %0 : f32 to vector<8x32xf32>
    %80 = arith.mulf %79, %68 : vector<8x32xf32>
    %81 = arith.addf %80, %78 : vector<8x32xf32>
    %cst_31 = arith.constant 1.000000e+00 : f32
    %82 = vector.broadcast %cst_31 : f32 to vector<8x32xf32>
    %83 = arith.mulf %74, %82 : vector<8x32xf32>
    %84 = arith.subf %81, %83 : vector<8x32xf32>
    %85 = arith.index_cast %76 : i32 to index
    %c0_32 = arith.constant 0 : index
    %86 = vector.load %arg8[%85, %c0_32] : memref<64x32xf32, #tpu.memory_space<vmem>>, vector<8x32xf32>
    tpu.vector_store %arg8[%85, %c0_32], %84 {strides = array<i32>} : memref<64x32xf32, #tpu.memory_space<vmem>>, vector<8x32xf32>,
    %cst_33 = arith.constant 1.000000e+00 : f32
    %87 = vector.broadcast %cst_33 : f32 to vector<8x32xf32>
    %88 = arith.cmpf ogt, %84, %87 : vector<8x32xf32>
    %89 = arith.extui %88 : vector<8x32xi1> to vector<8x32xi32>
    %90 = arith.sitofp %89 : vector<8x32xi32> to vector<8x32xf32>
    %c5_i32 = arith.constant 5 : i32
    %c8_i32_34 = arith.constant 8 : i32
    %91 = arith.muli %c5_i32, %c8_i32_34 : i32
    %92 = tpu.assume_multiple %91, 8 : i32
    %93 = arith.index_cast %92 : i32 to index
    %c0_35 = arith.constant 0 : index
    %94 = vector.load %arg8[%93, %c0_35] : memref<64x32xf32, #tpu.memory_space<vmem>>, vector<8x32xf32>
    %95 = vector.broadcast %0 : f32 to vector<8x32xf32>
    %96 = arith.mulf %95, %84 : vector<8x32xf32>
    %97 = arith.addf %96, %94 : vector<8x32xf32>
    %cst_36 = arith.constant 1.000000e+00 : f32
    %98 = vector.broadcast %cst_36 : f32 to vector<8x32xf32>
    %99 = arith.mulf %90, %98 : vector<8x32xf32>
    %100 = arith.subf %97, %99 : vector<8x32xf32>
    %101 = arith.index_cast %92 : i32 to index
    %c0_37 = arith.constant 0 : index
    %102 = vector.load %arg8[%101, %c0_37] : memref<64x32xf32, #tpu.memory_space<vmem>>, vector<8x32xf32>
    tpu.vector_store %arg8[%101, %c0_37], %100 {strides = array<i32>} : memref<64x32xf32, #tpu.memory_space<vmem>>, vector<8x32xf32>,
    %cst_38 = arith.constant 1.000000e+00 : f32
    %103 = vector.broadcast %cst_38 : f32 to vector<8x32xf32>
    %104 = arith.cmpf ogt, %100, %103 : vector<8x32xf32>
    %105 = arith.extui %104 : vector<8x32xi1> to vector<8x32xi32>
    %106 = arith.sitofp %105 : vector<8x32xi32> to vector<8x32xf32>
    %c6_i32 = arith.constant 6 : i32
    %c8_i32_39 = arith.constant 8 : i32
    %107 = arith.muli %c6_i32, %c8_i32_39 : i32
    %108 = tpu.assume_multiple %107, 8 : i32
    %109 = arith.index_cast %108 : i32 to index
    %c0_40 = arith.constant 0 : index
    %110 = vector.load %arg8[%109, %c0_40] : memref<64x32xf32, #tpu.memory_space<vmem>>, vector<8x32xf32>
    %111 = vector.broadcast %0 : f32 to vector<8x32xf32>
    %112 = arith.mulf %111, %100 : vector<8x32xf32>
    %113 = arith.addf %112, %110 : vector<8x32xf32>
    %cst_41 = arith.constant 1.000000e+00 : f32
    %114 = vector.broadcast %cst_41 : f32 to vector<8x32xf32>
    %115 = arith.mulf %106, %114 : vector<8x32xf32>
    %116 = arith.subf %113, %115 : vector<8x32xf32>
    %117 = arith.index_cast %108 : i32 to index
    %c0_42 = arith.constant 0 : index
    %118 = vector.load %arg8[%117, %c0_42] : memref<64x32xf32, #tpu.memory_space<vmem>>, vector<8x32xf32>
    tpu.vector_store %arg8[%117, %c0_42], %116 {strides = array<i32>} : memref<64x32xf32, #tpu.memory_space<vmem>>, vector<8x32xf32>,
    %cst_43 = arith.constant 1.000000e+00 : f32
    %119 = vector.broadcast %cst_43 : f32 to vector<8x32xf32>
    %120 = arith.cmpf ogt, %116, %119 : vector<8x32xf32>
    %121 = arith.extui %120 : vector<8x32xi1> to vector<8x32xi32>
    %122 = arith.sitofp %121 : vector<8x32xi32> to vector<8x32xf32>
    %c7_i32 = arith.constant 7 : i32
    %c8_i32_44 = arith.constant 8 : i32
    %123 = arith.muli %c7_i32, %c8_i32_44 : i32
    %124 = tpu.assume_multiple %123, 8 : i32
    %125 = arith.index_cast %124 : i32 to index
    %c0_45 = arith.constant 0 : index
    %126 = vector.load %arg8[%125, %c0_45] : memref<64x32xf32, #tpu.memory_space<vmem>>, vector<8x32xf32>
    %127 = vector.broadcast %0 : f32 to vector<8x32xf32>
    %128 = arith.mulf %127, %116 : vector<8x32xf32>
    %129 = arith.addf %128, %126 : vector<8x32xf32>
    %cst_46 = arith.constant 1.000000e+00 : f32
    %130 = vector.broadcast %cst_46 : f32 to vector<8x32xf32>
    %131 = arith.mulf %122, %130 : vector<8x32xf32>
    %132 = arith.subf %129, %131 : vector<8x32xf32>
    %133 = arith.index_cast %124 : i32 to index
    %c0_47 = arith.constant 0 : index
    %134 = vector.load %arg8[%133, %c0_47] : memref<64x32xf32, #tpu.memory_space<vmem>>, vector<8x32xf32>
    tpu.vector_store %arg8[%133, %c0_47], %132 {strides = array<i32>} : memref<64x32xf32, #tpu.memory_space<vmem>>, vector<8x32xf32>,
    %cst_48 = arith.constant 1.000000e+00 : f32
    %135 = vector.broadcast %cst_48 : f32 to vector<8x32xf32>
    %136 = arith.cmpf ogt, %132, %135 : vector<8x32xf32>
    %137 = arith.extui %136 : vector<8x32xi1> to vector<8x32xi32>
    %138 = arith.sitofp %137 : vector<8x32xi32> to vector<8x32xf32>
    %c8_i32_49 = arith.constant 8 : i32
    %c0_50 = arith.constant 0 : index
    %c0_51 = arith.constant 0 : index
    %139 = vector.load %arg8[%c0_50, %c0_51] : memref<64x32xf32, #tpu.memory_space<vmem>>, vector<64x32xf32>
    %cst_52 = arith.constant 1.000000e+00 : f32
    %140 = vector.broadcast %cst_52 : f32 to vector<64x32xf32>
    %141 = arith.cmpf ogt, %139, %140 : vector<64x32xf32>
    %142 = arith.extui %141 : vector<64x32xi1> to vector<64x32xi32>
    %143 = arith.sitofp %142 : vector<64x32xi32> to vector<64x32xf32>
    %144 = arith.truncf %143 : vector<64x32xf32> to vector<64x32xbf16>
    %c0_53 = arith.constant 0 : index
    %c0_54 = arith.constant 0 : index
    %145 = vector.load %arg3[%c0_53, %c0_54] : memref<32x128xbf16, #tpu.memory_space<vmem>>, vector<32x128xbf16>
    %cst_55 = arith.constant dense<0.000000e+00> : vector<64x128xf32>
    %146 = tpu.matmul %144, %145, %cst_55 {dimension_numbers = #tpu.dot_dimension_numbers<[1], [0], [0], [1], [0, 0, 1, 1], [], []>} : vector<64x32xbf16>, vector<32x128xbf16>, vector<64x128xf32> -> vector<64x128xf32>
    %c0_56 = arith.constant 0 : index
    %c0_57 = arith.constant 0 : index
    %147 = vector.load %arg4[%c0_56, %c0_57] : memref<1x128xf32, #tpu.memory_space<vmem>>, vector<1x128xf32>
    %148 = vector.broadcast %147 : vector<1x128xf32> to vector<64x128xf32>
    %149 = arith.addf %146, %148 : vector<64x128xf32>
    %c0_58 = arith.constant 0 : index
    %c0_59 = arith.constant 0 : index
    %150 = vector.load %arg7[%c0_58, %c0_59] : memref<64x128xf32, #tpu.memory_space<vmem>>, vector<64x128xf32>
    tpu.vector_store %arg7[%c0_58, %c0_59], %149 {strides = array<i32>} : memref<64x128xf32, #tpu.memory_space<vmem>>, vector<64x128xf32>,
    %cst_60 = arith.constant 0.000000e+00 : f32
    %151 = vector.broadcast %cst_60 : f32 to vector<8x128xf32>
    %cst_61 = arith.constant 0.000000e+00 : f32
    %152 = vector.broadcast %cst_61 : f32 to vector<8x128xf32>
    %c0_i32_62 = arith.constant 0 : i32
    %c8_i32_63 = arith.constant 8 : i32
    %153 = arith.muli %c0_i32_62, %c8_i32_63 : i32
    %154 = tpu.assume_multiple %153, 8 : i32
    %155 = arith.index_cast %154 : i32 to index
    %c0_64 = arith.constant 0 : index
    %156 = vector.load %arg7[%155, %c0_64] : memref<64x128xf32, #tpu.memory_space<vmem>>, vector<8x128xf32>
    %157 = vector.broadcast %1 : f32 to vector<8x128xf32>
    %158 = arith.mulf %157, %151 : vector<8x128xf32>
    %159 = arith.addf %158, %156 : vector<8x128xf32>
    %cst_65 = arith.constant 1.000000e+00 : f32
    %160 = vector.broadcast %cst_65 : f32 to vector<8x128xf32>
    %161 = arith.mulf %152, %160 : vector<8x128xf32>
    %162 = arith.subf %159, %161 : vector<8x128xf32>
    %163 = arith.index_cast %154 : i32 to index
    %c0_66 = arith.constant 0 : index
    %164 = vector.load %arg7[%163, %c0_66] : memref<64x128xf32, #tpu.memory_space<vmem>>, vector<8x128xf32>
    tpu.vector_store %arg7[%163, %c0_66], %162 {strides = array<i32>} : memref<64x128xf32, #tpu.memory_space<vmem>>, vector<8x128xf32>,
    %cst_67 = arith.constant 1.000000e+00 : f32
    %165 = vector.broadcast %cst_67 : f32 to vector<8x128xf32>
    %166 = arith.cmpf ogt, %162, %165 : vector<8x128xf32>
    %167 = arith.extui %166 : vector<8x128xi1> to vector<8x128xi32>
    %168 = arith.sitofp %167 : vector<8x128xi32> to vector<8x128xf32>
    %c1_i32_68 = arith.constant 1 : i32
    %c8_i32_69 = arith.constant 8 : i32
    %169 = arith.muli %c1_i32_68, %c8_i32_69 : i32
    %170 = tpu.assume_multiple %169, 8 : i32
    %171 = arith.index_cast %170 : i32 to index
    %c0_70 = arith.constant 0 : index
    %172 = vector.load %arg7[%171, %c0_70] : memref<64x128xf32, #tpu.memory_space<vmem>>, vector<8x128xf32>
    %173 = vector.broadcast %1 : f32 to vector<8x128xf32>
    %174 = arith.mulf %173, %162 : vector<8x128xf32>
    %175 = arith.addf %174, %172 : vector<8x128xf32>
    %cst_71 = arith.constant 1.000000e+00 : f32
    %176 = vector.broadcast %cst_71 : f32 to vector<8x128xf32>
    %177 = arith.mulf %168, %176 : vector<8x128xf32>
    %178 = arith.subf %175, %177 : vector<8x128xf32>
    %179 = arith.index_cast %170 : i32 to index
    %c0_72 = arith.constant 0 : index
    %180 = vector.load %arg7[%179, %c0_72] : memref<64x128xf32, #tpu.memory_space<vmem>>, vector<8x128xf32>
    tpu.vector_store %arg7[%179, %c0_72], %178 {strides = array<i32>} : memref<64x128xf32, #tpu.memory_space<vmem>>, vector<8x128xf32>,
    %cst_73 = arith.constant 1.000000e+00 : f32
    %181 = vector.broadcast %cst_73 : f32 to vector<8x128xf32>
    %182 = arith.cmpf ogt, %178, %181 : vector<8x128xf32>
    %183 = arith.extui %182 : vector<8x128xi1> to vector<8x128xi32>
    %184 = arith.sitofp %183 : vector<8x128xi32> to vector<8x128xf32>
    %c2_i32_74 = arith.constant 2 : i32
    %c8_i32_75 = arith.constant 8 : i32
    %185 = arith.muli %c2_i32_74, %c8_i32_75 : i32
    %186 = tpu.assume_multiple %185, 8 : i32
    %187 = arith.index_cast %186 : i32 to index
    %c0_76 = arith.constant 0 : index
    %188 = vector.load %arg7[%187, %c0_76] : memref<64x128xf32, #tpu.memory_space<vmem>>, vector<8x128xf32>
    %189 = vector.broadcast %1 : f32 to vector<8x128xf32>
    %190 = arith.mulf %189, %178 : vector<8x128xf32>
    %191 = arith.addf %190, %188 : vector<8x128xf32>
    %cst_77 = arith.constant 1.000000e+00 : f32
    %192 = vector.broadcast %cst_77 : f32 to vector<8x128xf32>
    %193 = arith.mulf %184, %192 : vector<8x128xf32>
    %194 = arith.subf %191, %193 : vector<8x128xf32>
    %195 = arith.index_cast %186 : i32 to index
    %c0_78 = arith.constant 0 : index
    %196 = vector.load %arg7[%195, %c0_78] : memref<64x128xf32, #tpu.memory_space<vmem>>, vector<8x128xf32>
    tpu.vector_store %arg7[%195, %c0_78], %194 {strides = array<i32>} : memref<64x128xf32, #tpu.memory_space<vmem>>, vector<8x128xf32>,
    %cst_79 = arith.constant 1.000000e+00 : f32
    %197 = vector.broadcast %cst_79 : f32 to vector<8x128xf32>
    %198 = arith.cmpf ogt, %194, %197 : vector<8x128xf32>
    %199 = arith.extui %198 : vector<8x128xi1> to vector<8x128xi32>
    %200 = arith.sitofp %199 : vector<8x128xi32> to vector<8x128xf32>
    %c3_i32_80 = arith.constant 3 : i32
    %c8_i32_81 = arith.constant 8 : i32
    %201 = arith.muli %c3_i32_80, %c8_i32_81 : i32
    %202 = tpu.assume_multiple %201, 8 : i32
    %203 = arith.index_cast %202 : i32 to index
    %c0_82 = arith.constant 0 : index
    %204 = vector.load %arg7[%203, %c0_82] : memref<64x128xf32, #tpu.memory_space<vmem>>, vector<8x128xf32>
    %205 = vector.broadcast %1 : f32 to vector<8x128xf32>
    %206 = arith.mulf %205, %194 : vector<8x128xf32>
    %207 = arith.addf %206, %204 : vector<8x128xf32>
    %cst_83 = arith.constant 1.000000e+00 : f32
    %208 = vector.broadcast %cst_83 : f32 to vector<8x128xf32>
    %209 = arith.mulf %200, %208 : vector<8x128xf32>
    %210 = arith.subf %207, %209 : vector<8x128xf32>
    %211 = arith.index_cast %202 : i32 to index
    %c0_84 = arith.constant 0 : index
    %212 = vector.load %arg7[%211, %c0_84] : memref<64x128xf32, #tpu.memory_space<vmem>>, vector<8x128xf32>
    tpu.vector_store %arg7[%211, %c0_84], %210 {strides = array<i32>} : memref<64x128xf32, #tpu.memory_space<vmem>>, vector<8x128xf32>,
    %cst_85 = arith.constant 1.000000e+00 : f32
    %213 = vector.broadcast %cst_85 : f32 to vector<8x128xf32>
    %214 = arith.cmpf ogt, %210, %213 : vector<8x128xf32>
    %215 = arith.extui %214 : vector<8x128xi1> to vector<8x128xi32>
    %216 = arith.sitofp %215 : vector<8x128xi32> to vector<8x128xf32>
    %c4_i32_86 = arith.constant 4 : i32
    %c8_i32_87 = arith.constant 8 : i32
    %217 = arith.muli %c4_i32_86, %c8_i32_87 : i32
    %218 = tpu.assume_multiple %217, 8 : i32
    %219 = arith.index_cast %218 : i32 to index
    %c0_88 = arith.constant 0 : index
    %220 = vector.load %arg7[%219, %c0_88] : memref<64x128xf32, #tpu.memory_space<vmem>>, vector<8x128xf32>
    %221 = vector.broadcast %1 : f32 to vector<8x128xf32>
    %222 = arith.mulf %221, %210 : vector<8x128xf32>
    %223 = arith.addf %222, %220 : vector<8x128xf32>
    %cst_89 = arith.constant 1.000000e+00 : f32
    %224 = vector.broadcast %cst_89 : f32 to vector<8x128xf32>
    %225 = arith.mulf %216, %224 : vector<8x128xf32>
    %226 = arith.subf %223, %225 : vector<8x128xf32>
    %227 = arith.index_cast %218 : i32 to index
    %c0_90 = arith.constant 0 : index
    %228 = vector.load %arg7[%227, %c0_90] : memref<64x128xf32, #tpu.memory_space<vmem>>, vector<8x128xf32>
    tpu.vector_store %arg7[%227, %c0_90], %226 {strides = array<i32>} : memref<64x128xf32, #tpu.memory_space<vmem>>, vector<8x128xf32>,
    %cst_91 = arith.constant 1.000000e+00 : f32
    %229 = vector.broadcast %cst_91 : f32 to vector<8x128xf32>
    %230 = arith.cmpf ogt, %226, %229 : vector<8x128xf32>
    %231 = arith.extui %230 : vector<8x128xi1> to vector<8x128xi32>
    %232 = arith.sitofp %231 : vector<8x128xi32> to vector<8x128xf32>
    %c5_i32_92 = arith.constant 5 : i32
    %c8_i32_93 = arith.constant 8 : i32
    %233 = arith.muli %c5_i32_92, %c8_i32_93 : i32
    %234 = tpu.assume_multiple %233, 8 : i32
    %235 = arith.index_cast %234 : i32 to index
    %c0_94 = arith.constant 0 : index
    %236 = vector.load %arg7[%235, %c0_94] : memref<64x128xf32, #tpu.memory_space<vmem>>, vector<8x128xf32>
    %237 = vector.broadcast %1 : f32 to vector<8x128xf32>
    %238 = arith.mulf %237, %226 : vector<8x128xf32>
    %239 = arith.addf %238, %236 : vector<8x128xf32>
    %cst_95 = arith.constant 1.000000e+00 : f32
    %240 = vector.broadcast %cst_95 : f32 to vector<8x128xf32>
    %241 = arith.mulf %232, %240 : vector<8x128xf32>
    %242 = arith.subf %239, %241 : vector<8x128xf32>
    %243 = arith.index_cast %234 : i32 to index
    %c0_96 = arith.constant 0 : index
    %244 = vector.load %arg7[%243, %c0_96] : memref<64x128xf32, #tpu.memory_space<vmem>>, vector<8x128xf32>
    tpu.vector_store %arg7[%243, %c0_96], %242 {strides = array<i32>} : memref<64x128xf32, #tpu.memory_space<vmem>>, vector<8x128xf32>,
    %cst_97 = arith.constant 1.000000e+00 : f32
    %245 = vector.broadcast %cst_97 : f32 to vector<8x128xf32>
    %246 = arith.cmpf ogt, %242, %245 : vector<8x128xf32>
    %247 = arith.extui %246 : vector<8x128xi1> to vector<8x128xi32>
    %248 = arith.sitofp %247 : vector<8x128xi32> to vector<8x128xf32>
    %c6_i32_98 = arith.constant 6 : i32
    %c8_i32_99 = arith.constant 8 : i32
    %249 = arith.muli %c6_i32_98, %c8_i32_99 : i32
    %250 = tpu.assume_multiple %249, 8 : i32
    %251 = arith.index_cast %250 : i32 to index
    %c0_100 = arith.constant 0 : index
    %252 = vector.load %arg7[%251, %c0_100] : memref<64x128xf32, #tpu.memory_space<vmem>>, vector<8x128xf32>
    %253 = vector.broadcast %1 : f32 to vector<8x128xf32>
    %254 = arith.mulf %253, %242 : vector<8x128xf32>
    %255 = arith.addf %254, %252 : vector<8x128xf32>
    %cst_101 = arith.constant 1.000000e+00 : f32
    %256 = vector.broadcast %cst_101 : f32 to vector<8x128xf32>
    %257 = arith.mulf %248, %256 : vector<8x128xf32>
    %258 = arith.subf %255, %257 : vector<8x128xf32>
    %259 = arith.index_cast %250 : i32 to index
    %c0_102 = arith.constant 0 : index
    %260 = vector.load %arg7[%259, %c0_102] : memref<64x128xf32, #tpu.memory_space<vmem>>, vector<8x128xf32>
    tpu.vector_store %arg7[%259, %c0_102], %258 {strides = array<i32>} : memref<64x128xf32, #tpu.memory_space<vmem>>, vector<8x128xf32>,
    %cst_103 = arith.constant 1.000000e+00 : f32
    %261 = vector.broadcast %cst_103 : f32 to vector<8x128xf32>
    %262 = arith.cmpf ogt, %258, %261 : vector<8x128xf32>
    %263 = arith.extui %262 : vector<8x128xi1> to vector<8x128xi32>
    %264 = arith.sitofp %263 : vector<8x128xi32> to vector<8x128xf32>
    %c7_i32_104 = arith.constant 7 : i32
    %c8_i32_105 = arith.constant 8 : i32
    %265 = arith.muli %c7_i32_104, %c8_i32_105 : i32
    %266 = tpu.assume_multiple %265, 8 : i32
    %267 = arith.index_cast %266 : i32 to index
    %c0_106 = arith.constant 0 : index
    %268 = vector.load %arg7[%267, %c0_106] : memref<64x128xf32, #tpu.memory_space<vmem>>, vector<8x128xf32>
    %269 = vector.broadcast %1 : f32 to vector<8x128xf32>
    %270 = arith.mulf %269, %258 : vector<8x128xf32>
    %271 = arith.addf %270, %268 : vector<8x128xf32>
    %cst_107 = arith.constant 1.000000e+00 : f32
    %272 = vector.broadcast %cst_107 : f32 to vector<8x128xf32>
    %273 = arith.mulf %264, %272 : vector<8x128xf32>
    %274 = arith.subf %271, %273 : vector<8x128xf32>
    %275 = arith.index_cast %266 : i32 to index
    %c0_108 = arith.constant 0 : index
    %276 = vector.load %arg7[%275, %c0_108] : memref<64x128xf32, #tpu.memory_space<vmem>>, vector<8x128xf32>
    tpu.vector_store %arg7[%275, %c0_108], %274 {strides = array<i32>} : memref<64x128xf32, #tpu.memory_space<vmem>>, vector<8x128xf32>,
    %cst_109 = arith.constant 1.000000e+00 : f32
    %277 = vector.broadcast %cst_109 : f32 to vector<8x128xf32>
    %278 = arith.cmpf ogt, %274, %277 : vector<8x128xf32>
    %279 = arith.extui %278 : vector<8x128xi1> to vector<8x128xi32>
    %280 = arith.sitofp %279 : vector<8x128xi32> to vector<8x128xf32>
    %c8_i32_110 = arith.constant 8 : i32
    %c0_111 = arith.constant 0 : index
    %c0_112 = arith.constant 0 : index
    %281 = vector.load %arg7[%c0_111, %c0_112] : memref<64x128xf32, #tpu.memory_space<vmem>>, vector<64x128xf32>
    %cst_113 = arith.constant 1.000000e+00 : f32
    %282 = vector.broadcast %cst_113 : f32 to vector<64x128xf32>
    %283 = arith.cmpf ogt, %281, %282 : vector<64x128xf32>
    %284 = arith.extui %283 : vector<64x128xi1> to vector<64x128xi32>
    %285 = arith.sitofp %284 : vector<64x128xi32> to vector<64x128xf32>
    %286 = arith.truncf %285 : vector<64x128xf32> to vector<64x128xbf16>
    %c0_114 = arith.constant 0 : index
    %c0_115 = arith.constant 0 : index
    %287 = vector.load %arg6[%c0_114, %c0_115] : memref<64x128xbf16, #tpu.memory_space<vmem>>, vector<64x128xbf16>
    tpu.vector_store %arg6[%c0_114, %c0_115], %286 {strides = array<i32>} : memref<64x128xbf16, #tpu.memory_space<vmem>>, vector<64x128xbf16>,
    return
  }
}

</mosaic_0001>

<bundles_post_ra>
// kernel: tpu_custom_call.1
= control target key start
LH: loop header
LB: loop body
LE: loop exit
PB: predicated region body
PF: predicated region fallthrough
CT: control target
= control target key end

     0   :  { %13 = vsyncpa [#allocation5], 0  ;;  %s967_s0 = inlined_call_operand.vmem [shape: bf16[64,64], index: 0, kind: input, shape index: {}]   ;;  %s968_s1 = inlined_call_operand.vmem [shape: bf16[64,32], index: 1, kind: input, shape index: {}]   ;;  %s969_s2 = inlined_call_operand.vmem [shape: f32[1,32], index: 2, kind: input, shape index: {}]   ;;  %s970_s3 = inlined_call_operand.vmem [shape: bf16[32,128], index: 3, kind: input, shape index: {}]   ;;  %s971_s4 = inlined_call_operand.vmem [shape: f32[1,128], index: 4, kind: input, shape index: {}]   ;;  %s972_s5 = inlined_call_operand.vmem [shape: f32[3], index: 5, kind: input, shape index: {}]   ;;  %s973_s6 = inlined_call_operand.hbm [shape: bf16[64,128], index: 6, kind: output, shape index: {0}]   ;;  %s974_s7 = inlined_call_operand.hbm [shape: f32[64,128], index: 7, kind: output, shape index: {1}]  }
   0x1   :  { %14 = vsyncpa [#allocation4], 0 }
   0x2   :  { %15 = vsyncpa [#allocation8], 0  ;;  %s32_s26 = sshll.u32 %s972_s5, 4  ;;  %s33_s26 = int_to_ptr.vmem [resolvable:$true] %s32_s26 }
   0x3   :  { %s724_s27 = scalar_lea.vmem %s33_s26, 16  ;;  %p729_p1 = scmp.lt.s32.totalorder %s33_s26, %s33_s26 }
   0x4   :  { %p725_p0 = scmp.ne.s32.totalorder %s33_s26, %s724_s27  ;;  %p730_p2 = scmp.lt.s32.totalorder %s724_s27, %s724_s27 }
   0x6   :  { %p731_p3 = por %p730_p2, %p729_p1 }
   0x8   :  { %p732_p4 = pnand %p731_p3, %p725_p0 }
   0xa   :  { %735 = shalt.err (!%p732_p4)
}
   0xb   :  { %s786_s28 = smov [#allocation3]  }
   0xc   :  { %35 = dma.vmem_to_smem %s33_s26, 16, %s786_s28, [#allocation5]  }
   0xd   :  { %780 = dma.done.wait [#allocation5], 16  }
   0xe   :  { %781 = vsyncadd [#allocation5], 4294967280 }
   0xf   :  { %39 = sfence }
  0x10   :  { %v714_v0 = vld [vmem:[%s968_s1] sm:$0xff]   ;;  %v715_v1 = vld [vmem:[%s968_s1 + $0x8] sm:$0xff]   ;;  %v716_v2 = vld [vmem:[%s968_s1 + $0x10] sm:$0xff]   ;;  %vm110_vm0 = vcmask 523264   ;;  %s41_s24 = sld [smem:[#allocation3]]  ;;  %vm188_vm1 = vcmask 261120  }
  0x11   :  { %678 = vmatprep.subr.bf16.mxu0 %v714_v0  ;;  %v718_v3 = vld [vmem:[%s967_s0] sm:$0xff]   ;;  %v717_v4 = vld [vmem:[%s968_s1 + $0x18] sm:$0xff]   ;;  %v719_v5 = vld [vmem:[%s967_s0 + $0x8] sm:$0xff]   ;;  %v787_v34 = vmov 0.0   ;;  %s789_s28 = smov [#allocation6]  }
  0x12   :  { %679 = vmatpush3.bf16.msra.mxu0 %v714_v0  ;;  %686 = vmatprep.mubr.msk.bf16.mxu0 %vm110_vm0, %v718_v3  ;;  %v720_v6 = vld [vmem:[%s967_s0 + $0x10] sm:$0xff]   ;;  %v721_v7 = vld [vmem:[%s967_s0 + $0x18] sm:$0xff]   ;;  %v722_v8 = vld [vmem:[%s970_s3] sm:$0xff]   ;;  %s582_s0 = sld [smem:[#allocation3 + $0x2]]  ;;  %s554_s29 = sshll.u32 %s789_s28, 4  ;;  %s935_s29 = int_to_ptr.vmem [resolvable:$true] %s554_s29 }
  0x13   :  { %680 = vmatprep.subr.bf16.mxu0 %v715_v1  ;;  %694 = vmatprep.subr.bf16.mxu1 %v722_v8  ;;  %v723_v9 = vld [vmem:[%s970_s3 + $0x8] sm:$0xff]   ;;  %v583_v10 = vld [vmem:[%s969_s2] ss:$0 sm:$0xff] }
  0x14   :  { %695 = vmatpush3.bf16.msra.mxu1 %v722_v8 }
  0x15   :  { %696 = vmatprep.subr.bf16.mxu1 %v723_v9 }
  0x16   :  { %681 = vmatpush3.bf16.msra.mxu0 %v715_v1  ;;  %v872_v19 = vstv %s41_s24 }
  0x17   :  { %682 = vmatprep.subr.bf16.mxu0 %v716_v2  ;;  %v199_v20 = vmul.f32 0.0, %v872_v19 }
  0x18   :  { %697 = vmatpush3.bf16.msra.mxu1 %v723_v9 }
  0x1a   :  { %683 = vmatpush3.bf16.msra.mxu0 %v716_v2 }
  0x1b   :  { %684 = vmatprep.subr.bf16.mxu0 %v717_v4 }
  0x1e   :  { %685 = vmatpush3.bf16.msra.mxu0 %v717_v4 }
  0x21   :  { %687 = vmatmul.mubr.msk.bf16.vlgmr.msra.gmra.mrb[0].mxu0 %vm110_vm0, %v719_v5 }
  0x22   :  { %690 = vmatprep.mubr.msk.bf16.mxu0 %vm110_vm0, %v720_v6 }
  0x29   :  { %691 = vmatmul.mubr.msk.bf16.gmra.mrb[4].mxu0 %vm110_vm0, %v721_v7 }
  0xf4   :  { %v688_v11 = vpop.f32.mrb[0].mxu0 }
  0xf5   :  { %v166_v12 = vadd.f32 %v688_v11, %v583_v10  ;;  %v157_v13 = vpop.f32.mrb[1].mxu0 }
  0xf6   :  { %v158_v14 = vadd.f32 %v583_v10, %v157_v13  ;;  %v689_v15 = vpop.f32.mrb[2].mxu0 }
  0xf7   :  { %191 = vst.msk [vmem:[#allocation2 + $0x10] sm:$0xff] %vm188_vm1, %v166_v12  ;;  %v169_v16 = vadd.f32 %v689_v15, %v583_v10  ;;  %v160_v17 = vpop.f32.mrb[3].mxu0 }
  0xf8   :  { %189 = vst.msk [vmem:[#allocation2] sm:$0xff] %vm188_vm1, %v158_v14  ;;  %v161_v18 = vadd.f32 %v583_v10, %v160_v17 }
  0xf9   :  { %192 = vst.msk [vmem:[#allocation2 + $0x18] sm:$0xff] %vm188_vm1, %v169_v16 }
  0xfa   :  { %190 = vst.msk [vmem:[#allocation2 + $0x8] sm:$0xff] %vm188_vm1, %v161_v18 }
  0xfc   :  { %v692_v21 = vpop.f32.mrb[4].mxu0 }
  0xfd   :  { %v182_v22 = vadd.f32 %v692_v21, %v583_v10  ;;  %v173_v23 = vpop.f32.mrb[5].mxu0 }
  0xfe   :  { %v174_v24 = vadd.f32 %v583_v10, %v173_v23  ;;  %v693_v25 = vpop.f32.mrb[6].mxu0  ;;  %v215_v38 = vld [vmem:[#allocation2 + $0x10] sm:$0xff]  ;;  %v915_v23 = vstv %s582_s0 }
  0xff   :  { %v197_v26 = vld [vmem:[#allocation2] sm:$0xff]  ;;  %195 = vst.msk [vmem:[#allocation2 + $0x30] sm:$0xff] %vm188_vm1, %v182_v22  ;;  %v185_v27 = vadd.f32 %v693_v25, %v583_v10  ;;  %v176_v28 = vpop.f32.mrb[7].mxu0 }
 0x100   :  { %v200_v29 = vadd.f32 %v199_v20, %v197_v26  ;;  %193 = vst.msk [vmem:[#allocation2 + $0x20] sm:$0xff] %vm188_vm1, %v174_v24  ;;  %v177_v30 = vadd.f32 %v583_v10, %v176_v28  ;;  %v224_v44 = vld [vmem:[#allocation2 + $0x18] sm:$0xff]  ;;  %v611_v24 = vld [vmem:[%s971_s4] ss:$0 sm:$0xff]  ;;  %v411_v26 = vmul.f32 0.0, %v915_v23  ;;  %s788_s4 = smov [#allocation7]  }
 0x101   :  { %196 = vst.msk [vmem:[#allocation2 + $0x38] sm:$0xff] %vm188_vm1, %v185_v27  ;;  %v206_v32 = vld [vmem:[#allocation2 + $0x8] sm:$0xff]  ;;  %s566_s27 = sshll.u32 %s788_s4, 4  ;;  %s567_s27 = int_to_ptr.vmem [resolvable:$true] %s566_s27 }
 0x102   :  { %201 = vst.msk [vmem:[#allocation2] sm:$0xff] %vm188_vm1, %v200_v29  ;;  %vm202_vm2 = vcmp.gt.f32.partialorder %v200_v29, 1.0  ;;  %v207_v31 = vmul.f32 %v200_v29, %v872_v19  ;;  %194 = vst.msk [vmem:[#allocation2 + $0x28] sm:$0xff] %vm188_vm1, %v177_v30  ;;  %s736_s30 = scalar_lea.vmem %s567_s27, 1024  ;;  %p741_p6 = scmp.lt.s32.totalorder %s567_s27, %s567_s27 }
 0x103   :  { %v596_v35 = vsel %vm202_vm2, 1.0, %v787_v34  ;;  %p737_p5 = scmp.ne.s32.totalorder %s567_s27, %s736_s30  ;;  %p742_p7 = scmp.lt.s32.totalorder %s736_s30, %s736_s30 }
 0x104   :  { %v208_v33 = vadd.f32 %v207_v31, %v206_v32 }
 0x105   :  { %p743_p8 = por %p742_p7, %p741_p6 }
 0x106   :  { %v209_v36 = vsub.f32 %v208_v33, %v596_v35  ;;  %v251_v4 = vld [vmem:[#allocation2 + $0x30] sm:$0xff] }
 0x107   :  { %v233_v52 = vld [vmem:[#allocation2 + $0x20] sm:$0xff]  ;;  %p744_p9 = pnand %p743_p8, %p737_p5 }
 0x108   :  { %210 = vst.msk [vmem:[#allocation2 + $0x8] sm:$0xff] %vm188_vm1, %v209_v36  ;;  %vm211_vm3 = vcmp.gt.f32.partialorder %v209_v36, 1.0  ;;  %v216_v37 = vmul.f32 %v209_v36, %v872_v19  ;;  %v260_v10 = vld [vmem:[#allocation2 + $0x38] sm:$0xff] }
 0x109   :  { %v597_v40 = vsel %vm211_vm3, 1.0, %v787_v34  ;;  %v265_v41 = vld [vmem:[#allocation2] sm:$0xff]  ;;  %v242_v59 = vld [vmem:[#allocation2 + $0x28] sm:$0xff] }
 0x10a   :  { %v217_v39 = vadd.f32 %v216_v37, %v215_v38  ;;  %vm273_vm5 = vcmp.gt.f32.partialorder %v265_v41, 1.0 }
 0x10b   :  { %v603_v48 = vsel %vm273_vm5, 1.0, %v787_v34 }
 0x10c   :  { %v218_v42 = vsub.f32 %v217_v39, %v597_v40 }
 0x10e   :  { %219 = vst.msk [vmem:[#allocation2 + $0x10] sm:$0xff] %vm188_vm1, %v218_v42  ;;  %vm220_vm4 = vcmp.gt.f32.partialorder %v218_v42, 1.0  ;;  %v225_v43 = vmul.f32 %v218_v42, %v872_v19 }
 0x10f   :  { %v266_v45 = vld [vmem:[#allocation2 + $0x8] sm:$0xff]  ;;  %v598_v47 = vsel %vm220_vm4, 1.0, %v787_v34 }
 0x110   :  { %v226_v46 = vadd.f32 %v225_v43, %v224_v44  ;;  %vm274_vm6 = vcmp.gt.f32.partialorder %v266_v45, 1.0 }
 0x111   :  { %v604_v49 = vsel %vm274_vm6, 1.0, %v787_v34 }
 0x112   :  { %v227_v50 = vsub.f32 %v226_v46, %v598_v47  ;;  %v297_v51 = vpack.c.bf16 %v604_v49, %v603_v48 }
 0x114   :  { %228 = vst.msk [vmem:[#allocation2 + $0x18] sm:$0xff] %vm188_vm1, %v227_v50  ;;  %vm229_vm7 = vcmp.gt.f32.partialorder %v227_v50, 1.0  ;;  %v234_v53 = vmul.f32 %v227_v50, %v872_v19  ;;  %698 = vmatprep.mubr.msk.bf16.mxu1 %vm188_vm1, %v297_v51 }
 0x115   :  { %v599_v55 = vsel %vm229_vm7, 1.0, %v787_v34  ;;  %v267_v56 = vld [vmem:[#allocation2 + $0x10] sm:$0xff] }
 0x116   :  { %v235_v54 = vadd.f32 %v234_v53, %v233_v52  ;;  %vm275_vm9 = vcmp.gt.f32.partialorder %v267_v56, 1.0 }
 0x117   :  { %v605_v63 = vsel %vm275_vm9, 1.0, %v787_v34 }
 0x118   :  { %v236_v57 = vsub.f32 %v235_v54, %v599_v55 }
 0x11a   :  { %237 = vst.msk [vmem:[#allocation2 + $0x20] sm:$0xff] %vm188_vm1, %v236_v57  ;;  %vm238_vm8 = vcmp.gt.f32.partialorder %v236_v57, 1.0  ;;  %v243_v58 = vmul.f32 %v236_v57, %v872_v19 }
 0x11b   :  { %v268_v60 = vld [vmem:[#allocation2 + $0x18] sm:$0xff]  ;;  %v600_v62 = vsel %vm238_vm8, 1.0, %v787_v34 }
 0x11c   :  { %v244_v61 = vadd.f32 %v243_v58, %v242_v59  ;;  %vm276_vm10 = vcmp.gt.f32.partialorder %v268_v60, 1.0 }
 0x11d   :  { %v606_v0 = vsel %vm276_vm10, 1.0, %v787_v34 }
 0x11e   :  { %v245_v1 = vsub.f32 %v244_v61, %v600_v62  ;;  %v298_v2 = vpack.c.bf16 %v606_v0, %v605_v63 }
 0x120   :  { %246 = vst.msk [vmem:[#allocation2 + $0x28] sm:$0xff] %vm188_vm1, %v245_v1  ;;  %vm247_vm11 = vcmp.gt.f32.partialorder %v245_v1, 1.0  ;;  %v252_v3 = vmul.f32 %v245_v1, %v872_v19  ;;  %699 = vmatmul.mubr.msk.bf16.vlgmr.msra.gmra.mrb[0].mxu1 %vm188_vm1, %v298_v2 }
 0x121   :  { %v601_v6 = vsel %vm247_vm11, 1.0, %v787_v34  ;;  %v269_v7 = vld [vmem:[#allocation2 + $0x20] sm:$0xff] }
 0x122   :  { %v253_v5 = vadd.f32 %v252_v3, %v251_v4  ;;  %vm277_vm13 = vcmp.gt.f32.partialorder %v269_v7, 1.0 }
 0x123   :  { %v607_v14 = vsel %vm277_vm13, 1.0, %v787_v34 }
 0x124   :  { %v254_v8 = vsub.f32 %v253_v5, %v601_v6 }
 0x126   :  { %255 = vst.msk [vmem:[#allocation2 + $0x30] sm:$0xff] %vm188_vm1, %v254_v8  ;;  %vm256_vm12 = vcmp.gt.f32.partialorder %v254_v8, 1.0  ;;  %v261_v9 = vmul.f32 %v254_v8, %v872_v19 }
 0x127   :  { %v270_v11 = vld [vmem:[#allocation2 + $0x28] sm:$0xff]  ;;  %v602_v13 = vsel %vm256_vm12, 1.0, %v787_v34 }
 0x128   :  { %v262_v12 = vadd.f32 %v261_v9, %v260_v10  ;;  %vm278_vm14 = vcmp.gt.f32.partialorder %v270_v11, 1.0 }
 0x129   :  { %v608_v15 = vsel %vm278_vm14, 1.0, %v787_v34 }
 0x12a   :  { %v263_v16 = vsub.f32 %v262_v12, %v602_v13  ;;  %v299_v17 = vpack.c.bf16 %v608_v15, %v607_v14 }
 0x12c   :  { %264 = vst.msk [vmem:[#allocation2 + $0x38] sm:$0xff] %vm188_vm1, %v263_v16  ;;  %702 = vmatprep.mubr.msk.bf16.mxu1 %vm188_vm1, %v299_v17 }
 0x12d   :  { %v271_v18 = vld [vmem:[#allocation2 + $0x30] sm:$0xff] }
 0x12e   :  { %vm279_vm15 = vcmp.gt.f32.partialorder %v271_v18, 1.0 }
 0x12f   :  { %v609_v20 = vsel %vm279_vm15, 1.0, %v787_v34 }
 0x133   :  { %v272_v19 = vld [vmem:[#allocation2 + $0x38] sm:$0xff] }
 0x134   :  { %vm280_vm0 = vcmp.gt.f32.partialorder %v272_v19, 1.0 }
 0x135   :  { %v610_v21 = vsel %vm280_vm0, 1.0, %v787_v34 }
 0x136   :  { %v300_v22 = vpack.c.bf16 %v610_v21, %v609_v20 }
 0x138   :  { %703 = vmatmul.mubr.msk.bf16.gmra.mrb[4].mxu1 %vm188_vm1, %v300_v22 }
 0x1f3   :  { %v700_v25 = vpop.f32.mrb[0].mxu1 }
 0x1f4   :  { %v370_v27 = vpop.f32.mrb[1].mxu1  ;;  %v379_v38 = vadd.f32 %v700_v25, %v611_v24 }
 0x1f5   :  { %v371_v28 = vadd.f32 %v611_v24, %v370_v27  ;;  %v701_v29 = vpop.f32.mrb[2].mxu1 }
 0x1f6   :  { %v373_v30 = vpop.f32.mrb[3].mxu1  ;;  %v382_v44 = vadd.f32 %v701_v29, %v611_v24 }
 0x1f7   :  { %v412_v31 = vadd.f32 %v411_v26, %v371_v28  ;;  %v374_v32 = vadd.f32 %v611_v24, %v373_v30 }
 0x1f9   :  { %413 = vst [vmem:[#allocation7] sm:$0xff] %v412_v31  ;;  %vm414_vm2 = vcmp.gt.f32.partialorder %v412_v31, 1.0  ;;  %v419_v33 = vmul.f32 %v412_v31, %v915_v23 }
 0x1fa   :  { %v618_v36 = vsel %vm414_vm2, 1.0, %v787_v34 }
 0x1fb   :  { %v420_v35 = vadd.f32 %v419_v33, %v374_v32 }
 0x1fd   :  { %v421_v37 = vsub.f32 %v420_v35, %v618_v36 }
 0x1ff   :  { %422 = vst [vmem:[#allocation7 + $0x8] sm:$0xff] %v421_v37  ;;  %vm423_vm1 = vcmp.gt.f32.partialorder %v421_v37, 1.0  ;;  %v428_v39 = vmul.f32 %v421_v37, %v915_v23 }
 0x200   :  { %v619_v40 = vsel %vm423_vm1, 1.0, %v787_v34 }
 0x201   :  { %v429_v41 = vadd.f32 %v428_v39, %v379_v38  ;;  %v650_v42 = vpack.c.bf16 %v619_v40, %v618_v36 }
 0x203   :  { %v430_v43 = vsub.f32 %v429_v41, %v619_v40  ;;  %651 = vst [vmem:[#allocation6] sm:$0xff] %v650_v42  }
 0x205   :  { %431 = vst [vmem:[#allocation7 + $0x10] sm:$0xff] %v430_v43  ;;  %vm432_vm3 = vcmp.gt.f32.partialorder %v430_v43, 1.0  ;;  %v437_v45 = vmul.f32 %v430_v43, %v915_v23 }
 0x206   :  { %v620_v47 = vsel %vm432_vm3, 1.0, %v787_v34 }
 0x207   :  { %v438_v46 = vadd.f32 %v437_v45, %v382_v44 }
 0x209   :  { %v439_v48 = vsub.f32 %v438_v46, %v620_v47 }
 0x20b   :  { %v704_v49 = vpop.f32.mrb[4].mxu1  ;;  %440 = vst [vmem:[#allocation7 + $0x18] sm:$0xff] %v439_v48  ;;  %vm441_vm4 = vcmp.gt.f32.partialorder %v439_v48, 1.0  ;;  %v446_v53 = vmul.f32 %v439_v48, %v915_v23 }
 0x20c   :  { %v386_v50 = vpop.f32.mrb[5].mxu1  ;;  %v621_v51 = vsel %vm441_vm4, 1.0, %v787_v34  ;;  %v395_v0 = vadd.f32 %v704_v49, %v611_v24 }
 0x20d   :  { %v387_v52 = vadd.f32 %v611_v24, %v386_v50  ;;  %v705_v54 = vpop.f32.mrb[6].mxu1  ;;  %v653_v55 = vpack.c.bf16 %v621_v51, %v620_v47 }
 0x20e   :  { %v389_v56 = vpop.f32.mrb[7].mxu1  ;;  %v398_v6 = vadd.f32 %v705_v54, %v611_v24 }
 0x20f   :  { %v447_v57 = vadd.f32 %v446_v53, %v387_v52  ;;  %661 = vst [vmem:[#allocation6 + $0x8] sm:$0xff] %v653_v55   ;;  %v390_v59 = vadd.f32 %v611_v24, %v389_v56 }
 0x211   :  { %v448_v58 = vsub.f32 %v447_v57, %v621_v51 }
 0x213   :  { %449 = vst [vmem:[#allocation7 + $0x20] sm:$0xff] %v448_v58  ;;  %vm450_vm5 = vcmp.gt.f32.partialorder %v448_v58, 1.0  ;;  %v455_v60 = vmul.f32 %v448_v58, %v915_v23 }
 0x214   :  { %v622_v62 = vsel %vm450_vm5, 1.0, %v787_v34 }
 0x215   :  { %v456_v61 = vadd.f32 %v455_v60, %v390_v59 }
 0x217   :  { %v457_v63 = vsub.f32 %v456_v61, %v622_v62 }
 0x219   :  { %458 = vst [vmem:[#allocation7 + $0x28] sm:$0xff] %v457_v63  ;;  %vm459_vm6 = vcmp.gt.f32.partialorder %v457_v63, 1.0  ;;  %v464_v1 = vmul.f32 %v457_v63, %v915_v23 }
 0x21a   :  { %v623_v2 = vsel %vm459_vm6, 1.0, %v787_v34 }
 0x21b   :  { %v465_v3 = vadd.f32 %v464_v1, %v395_v0  ;;  %v656_v4 = vpack.c.bf16 %v623_v2, %v622_v62 }
 0x21d   :  { %v466_v5 = vsub.f32 %v465_v3, %v623_v2  ;;  %662 = vst [vmem:[#allocation6 + $0x10] sm:$0xff] %v656_v4  }
 0x21f   :  { %467 = vst [vmem:[#allocation7 + $0x30] sm:$0xff] %v466_v5  ;;  %vm468_vm7 = vcmp.gt.f32.partialorder %v466_v5, 1.0  ;;  %v473_v7 = vmul.f32 %v466_v5, %v915_v23 }
 0x220   :  { %v624_v9 = vsel %vm468_vm7, 1.0, %v787_v34 }
 0x221   :  { %v474_v8 = vadd.f32 %v473_v7, %v398_v6 }
 0x223   :  { %v475_v10 = vsub.f32 %v474_v8, %v624_v9 }
 0x225   :  { %476 = vst [vmem:[#allocation7 + $0x38] sm:$0xff] %v475_v10  ;;  %vm492_vm8 = vcmp.gt.f32.partialorder %v475_v10, 1.0 }
 0x226   :  { %v632_v11 = vsel %vm492_vm8, 1.0, %v787_v34 }
 0x227   :  { %747 = shalt.err (!%p744_p9)
}
 0x228   :  { %s748_s5 = scalar_lea.hbm %s974_s7, 1024 }
 0x229   :  { %p749_p10 = scmp.ne.s32.totalorder %s974_s7, %s748_s5  ;;  %p752_p11 = scmp.lt.u32.totalorder %s748_s5, %s974_s7 }
 0x22b   :  { %p754_p12 = pnand %p752_p11, %p749_p10 }
 0x22d   :  { %757 = shalt.err (!%p754_p12)
}
 0x22e   :  { %s790_s14 = smov 128   ;;  %s791_s15 = smov 8   ;;  %v659_v34 = vpack.c.bf16 %v632_v11, %v624_v9 }
 0x22f   :  { %572 = dma.vmem_to_hbm [thread:$0]  %s567_s27, 1024, %s974_s7, [#allocation8], %s790_s14, %s790_s14, %s791_s15  }
 0x230   :  { %663 = vst [vmem:[#allocation6 + $0x18] sm:$0xff] %v659_v34   ;;  %s758_s18 = scalar_lea.vmem %s935_s29, 512  ;;  %p763_p0 = scmp.lt.s32.totalorder %s935_s29, %s935_s29 }
 0x231   :  { %p759_p13 = scmp.ne.s32.totalorder %s935_s29, %s758_s18  ;;  %p764_p1 = scmp.lt.s32.totalorder %s758_s18, %s758_s18 }
 0x233   :  { %p765_p2 = por %p764_p1, %p763_p0 }
 0x235   :  { %p766_p3 = pnand %p765_p2, %p759_p13 }
 0x237   :  { %769 = shalt.err (!%p766_p3)
}
 0x238   :  { %s770_s1 = scalar_lea.hbm %s973_s6, 512 }
 0x239   :  { %p771_p4 = scmp.ne.s32.totalorder %s973_s6, %s770_s1  ;;  %p774_p5 = scmp.lt.u32.totalorder %s770_s1, %s973_s6 }
 0x23b   :  { %p776_p6 = pnand %p774_p5, %p771_p4 }
 0x23d   :  { %779 = shalt.err (!%p776_p6)
}
 0x23e   :  { %s792_s24 = smov 64   ;;  %s793_s25 = smov 4  }
 0x23f   :  { %560 = dma.vmem_to_hbm [thread:$0]  %s935_s29, 512, %s973_s6, [#allocation4], %s792_s24, %s792_s24, %s793_s25  }
 0x240   :  { %782 = dma.done.wait [#allocation4], 512  }
 0x241   :  { %783 = vsyncadd [#allocation4], 4294966784 }
 0x242   :  { %784 = dma.done.wait [#allocation8], 1024  }
 0x243   :  { %785 = vsyncadd [#allocation8], 4294966272 }
 0x244   :  { %579 = vsyncpa [#allocation4], 1 }
 0x245   :  { %580 = vsyncpa [#allocation8], 1 }
 0x246   :  { %581 = vsyncpa [#allocation5], 1 }

</bundles_post_ra>
